<compile_context>
chip_gen: v7x
topology: tpu7x:2x2x1
jax: 0.10.0
libtpu: 0.0.40
codegen_flags: <defaults>
</compile_context>

<pallas_src>
import jax
import jax.numpy as jnp
from jax.experimental import pallas as pl
from jax.experimental.pallas import tpu as pltpu

_LANE = 128
_MAX_COLS = 1024
_MAX_BLOCK_BYTES = 8 * 1024 * 1024      # 8 MiB tiles (see header rationale)
_VMEM_LIMIT_BYTES = 48 * 1024 * 1024    # explicit: > 4x block, < 64 MiB (v7x)


def _identity_kernel(x_ref, o_ref):
    # Bare pass-through on the resident tile; no casts, no arithmetic.
    o_ref[...] = x_ref[...]


def identity(x: jax.Array) -> jax.Array:
    """nn.Identity forward: zero FLOPs, zero data movement — just return x."""
    return x


def _tiled_copy_2d(x2: jax.Array) -> jax.Array:
    """Pipelined lane-dense copy of a (rows, cols) slab with cols % 128 == 0."""
    rows, cols = x2.shape
    itemsize = jnp.dtype(x2.dtype).itemsize

    # Dtype-aware sublane alignment: 8 rows per sublane-group for 32-bit,
    # 16 for bf16/fp16, 32 for int8/fp8 (packed dtypes stack rows in sublanes).
    sublane = 8 * max(1, 4 // itemsize)

    tile_r = min(rows, max(1, _MAX_BLOCK_BYTES // (cols * itemsize)))
    tile_r -= tile_r % sublane
    if tile_r < sublane or tile_r >= rows:
        tile_r = rows  # single full-extent block (always (8,128)-legal)
    grid_r = pl.cdiv(rows, tile_r)

    return pl.pallas_call(
        _identity_kernel,
        out_shape=jax.ShapeDtypeStruct((rows, cols), x2.dtype),
        grid=(grid_r,),
        in_specs=[pl.BlockSpec((tile_r, cols), lambda i: (i, 0))],
        out_specs=pl.BlockSpec((tile_r, cols), lambda i: (i, 0)),
        compiler_params=pltpu.CompilerParams(
            dimension_semantics=("parallel",),
            vmem_limit_bytes=_VMEM_LIMIT_BYTES,
        ),
        cost_estimate=pl.CostEstimate(
            flops=0,
            transcendentals=0,
            bytes_accessed=2 * rows * cols * itemsize,
        ),
    )(x2)


def identity_pallas(x: jax.Array) -> jax.Array:
    """Materialized identity copy as a Pallas TPU kernel (lane-dense, tiled)."""
    size = int(x.size)
    if size == 0:
        return x

    flat = x.reshape(-1)  # contiguous row-major reshape: layout plumbing only

    if size % _LANE == 0:
        # Widen the lane dim up to 1024 for maximally dense, unmasked stores.
        cols = _LANE
        while size % (cols * 2) == 0 and cols * 2 <= _MAX_COLS:
            cols *= 2
        y2 = _tiled_copy_2d(flat.reshape(size // cols, cols))
        return y2.reshape(x.shape)

    # Odd total size: pad the flat view to a lane multiple, run the same
    # tiled/pipelined copy, slice back.  Always VMEM-safe (never a single
    # monolithic block), at the cost of the small pad/slice XLA copies.
    padded = ((size + _LANE - 1) // _LANE) * _LANE
    flat_p = jnp.pad(flat, (0, padded - size))
    y2 = _tiled_copy_2d(flat_p.reshape(padded // _LANE, _LANE))
    return y2.reshape(-1)[:size].reshape(x.shape)


if __name__ == "__main__":
    key = jax.random.PRNGKey(0)
    x = jax.random.normal(key, (2, 4, 16, 16), dtype=jnp.float32)  # NCHW

    # True Identity path (recommended in production): no kernel launch.
    y_fast = identity(x)
    assert y_fast is x

    # Materialized-copy Pallas kernel (lane-dense main path).
    y = identity_pallas(x)
    jax.block_until_ready(y)
    assert y.shape == x.shape, (y.shape, x.shape)
    assert y.dtype == x.dtype, (y.dtype, x.dtype)
    assert bool(jnp.all(y == x)), "Identity kernel output mismatch (f32)"

    # Packed-dtype path (exercises dtype-aware sublane alignment).
    xb = x.astype(jnp.bfloat16)
    yb = identity_pallas(xb)
    jax.block_until_ready(yb)
    assert yb.dtype == jnp.bfloat16
    assert bool(jnp.all(yb == xb)), "Identity kernel output mismatch (bf16)"

    # Odd-size path (size % 128 != 0): padded, tiled fallback.
    xo = jax.random.normal(key, (2, 3, 5, 7), dtype=jnp.float32)
    yo = identity_pallas(xo)
    jax.block_until_ready(yo)
    assert yo.shape == xo.shape
    assert bool(jnp.all(yo == xo)), "Identity kernel output mismatch (odd size)"

    print("KERNEL_OK")
</pallas_src>

<mosaic_0001>
module attributes {stable_mosaic.version = 11 : i64} {
  func.func @_identity_kernel(%arg0: i32, %arg1: memref<2x1024xf32, #tpu.memory_space<vmem>>, %arg2: memref<2x1024xf32, #tpu.memory_space<vmem>>) attributes {dimension_semantics = [#tpu.dimension_semantics<parallel>], iteration_bounds = array<i64: 1>, scalar_prefetch = 0 : i64, scratch_operands = 0 : i64, tpu.core_type = #tpu.core_type<tc>, window_params = [{transform_indices = @transform_0, window_bounds = array<i64: 2, 1024>}, {transform_indices = @transform_1, window_bounds = array<i64: 2, 1024>}]} {
    %c0 = arith.constant 0 : index
    %c0_0 = arith.constant 0 : index
    %0 = vector.load %arg1[%c0, %c0_0] : memref<2x1024xf32, #tpu.memory_space<vmem>>, vector<2x1024xf32>
    %c0_1 = arith.constant 0 : index
    %c0_2 = arith.constant 0 : index
    %1 = vector.load %arg2[%c0_1, %c0_2] : memref<2x1024xf32, #tpu.memory_space<vmem>>, vector<2x1024xf32>
    tpu.vector_store %arg2[%c0_1, %c0_2], %0 {strides = array<i32>} : memref<2x1024xf32, #tpu.memory_space<vmem>>, vector<2x1024xf32>,
    return
  }
  func.func @transform_0(%arg0: i32) -> (i32, i32) {
    %c0_i32 = arith.constant 0 : i32
    %c0_i32_0 = arith.constant 0 : i32
    return %arg0, %c0_i32 : i32, i32
  }
  func.func @transform_1(%arg0: i32) -> (i32, i32) {
    %c0_i32 = arith.constant 0 : i32
    %c0_i32_0 = arith.constant 0 : i32
    return %arg0, %c0_i32 : i32, i32
  }
}

</mosaic_0001>

<bundles_post_ra>
// kernel: tpu_custom_call.1
= control target key start
LH: loop header
LB: loop body
LE: loop exit
PB: predicated region body
PF: predicated region fallthrough
CT: control target
= control target key end

     0   :  { %6 = vsyncpa [#allocation3], 0  ;;  %s126_s0 = inlined_call_operand.hbm [shape: f32[2,1024], index: 0, kind: input, shape index: {}]   ;;  %s127_s1 = inlined_call_operand.hbm [shape: f32[2,1024], index: 1, kind: output, shape index: {}]  }
   0x1   :  { %7 = vsyncpa [#allocation4], 0  ;;  %s90_s6 = smov [#allocation2]   ;;  %s42_s10 = scalar_lea.hbm %s126_s0, 256 }
   0x2   :  { %s14_s7 = sshll.u32 %s90_s6, 4  ;;  %p43_p0 = scmp.ne.s32.totalorder %s126_s0, %s42_s10  ;;  %s15_s7 = int_to_ptr.vmem [resolvable:$true] %s14_s7 }
   0x3   :  { %p46_p1 = scmp.lt.u32.totalorder %s42_s10, %s126_s0 }
   0x5   :  { %p48_p2 = pnand %p46_p1, %p43_p0 }
   0x7   :  { %51 = shalt.err (!%p48_p2)
}
   0x8   :  { %s52_s15 = scalar_lea.vmem %s15_s7, 256  ;;  %p57_p4 = scmp.lt.s32.totalorder %s15_s7, %s15_s7 }
   0x9   :  { %p53_p3 = scmp.ne.s32.totalorder %s15_s7, %s52_s15  ;;  %p58_p5 = scmp.lt.s32.totalorder %s52_s15, %s52_s15 }
   0xb   :  { %p59_p6 = por %p58_p5, %p57_p4 }
   0xd   :  { %p60_p7 = pnand %p59_p6, %p53_p3 }
   0xf   :  { %63 = shalt.err (!%p60_p7)
}
  0x10   :  { %17 = dma.hbm_to_vmem [thread:$0]  %s126_s0, 256, %s15_s7, [#allocation3]  }
  0x11   :  { %86 = dma.done.wait [#allocation3], 256  }
  0x12   :  { %87 = vsyncadd [#allocation3], 4294967040  ;;  %s91_s18 = smov [#allocation5]   ;;  %v21_v0 = vld [vmem:[#allocation2] sm:$0xff]  ;;  %v22_v1 = vld [vmem:[#allocation2 + $0x8] sm:$0xff] }
  0x13   :  { %s31_s19 = sshll.u32 %s91_s18, 4  ;;  %23 = vst [vmem:[#allocation5] sm:$0xff] %v21_v0  ;;  %24 = vst [vmem:[#allocation5 + $0x8] sm:$0xff] %v22_v1  ;;  %s32_s19 = int_to_ptr.vmem [resolvable:$true] %s31_s19 }
  0x14   :  { %s64_s20 = scalar_lea.vmem %s32_s19, 256  ;;  %p69_p9 = scmp.lt.s32.totalorder %s32_s19, %s32_s19 }
  0x15   :  { %p65_p8 = scmp.ne.s32.totalorder %s32_s19, %s64_s20  ;;  %p70_p10 = scmp.lt.s32.totalorder %s64_s20, %s64_s20 }
  0x17   :  { %p71_p11 = por %p70_p10, %p69_p9 }
  0x19   :  { %p72_p12 = pnand %p71_p11, %p65_p8 }
  0x1b   :  { %75 = shalt.err (!%p72_p12)
}
  0x1c   :  { %s76_s0 = scalar_lea.hbm %s127_s1, 256 }
  0x1d   :  { %p77_p13 = scmp.ne.s32.totalorder %s127_s1, %s76_s0  ;;  %p80_p0 = scmp.lt.u32.totalorder %s76_s0, %s127_s1 }
  0x1f   :  { %p82_p1 = pnand %p80_p0, %p77_p13 }
  0x21   :  { %85 = shalt.err (!%p82_p1)
}
  0x22   :  { %34 = dma.vmem_to_hbm [thread:$0]  %s32_s19, 256, %s127_s1, [#allocation4]  }
  0x23   :  { %88 = dma.done.wait [#allocation4], 256  }
  0x24   :  { %89 = vsyncadd [#allocation4], 4294967040 }
  0x25   :  { %38 = vsyncpa [#allocation3], 1 }
  0x26   :  { %39 = vsyncpa [#allocation4], 1 }

</bundles_post_ra>
